<compile_context>
chip_gen: v6e
topology: v6e:2x2x1
jax: 0.10.0
libtpu: 0.0.40
codegen_flags: <defaults>
</compile_context>

<pallas_src>
import jax
import jax.numpy as jnp
from jax.experimental import pallas as pl
from jax.experimental.pallas import tpu as pltpu


def _round_up(x, m):
    return (x + m - 1) // m * m


def resmlp_kernel(tok_ref, w1_ref, b1_ref, w2_ref, b2_ref, w3_ref, b3_ref,
                  wo_ref, bo_ref, o_ref):
    """One batch tile of the residual MLP.

    tok_ref : (TB, P)      int32  token ids for this batch tile
    w1_ref  : (P, Vp, Hp)  f32    first-layer weights, split per window position
    b1..bo  : weights/biases with feature dims padded to 128 lanes
    o_ref   : (TB, Vp)     f32    lane-dense output tile
    """
    tb, num_pos = tok_ref.shape
    vp = w1_ref.shape[1]
    hp = w1_ref.shape[2]

    tok = tok_ref[...]                                          # (TB, P) int32
    lane_ids = jax.lax.broadcasted_iota(jnp.int32, (tb, vp), 1)

    # ---- input projection: one-hot(token) @ W1, one-hot built in-register ---
    acc = jnp.zeros((tb, hp), jnp.float32)
    for p in range(num_pos):                                    # static, small
        onehot = (lane_ids == tok[:, p:p + 1]).astype(jnp.float32)   # (TB, Vp)
        acc = acc + jnp.dot(onehot, w1_ref[p],
                            preferred_element_type=jnp.float32)
    h = jnp.maximum(acc + b1_ref[...], 0.0)                     # (TB, Hp)

    # ---- residual block ------------------------------------------------------
    z = jnp.dot(h, w2_ref[...], preferred_element_type=jnp.float32) + b2_ref[...]
    z = jnp.maximum(z, 0.0)
    z = jnp.dot(z, w3_ref[...], preferred_element_type=jnp.float32) + b3_ref[...]
    r = jnp.maximum(h + z, 0.0)                                 # (TB, Hp)

    # ---- output projection ---------------------------------------------------
    o_ref[...] = (jnp.dot(r, wo_ref[...], preferred_element_type=jnp.float32)
                  + bo_ref[...])                                # (TB, Vp)


def resmlp_forward(noised, params, vocab_size, hidden, *, batch_tile=None):
    """noised: int (B, window_size-1). Returns (B, vocab_size) float32."""
    noised = noised.astype(jnp.int32)
    B, P = noised.shape
    V, H = vocab_size, hidden
    w1, b1, w2, b2, w3, b3, wo, bo = params

    # Lane-dense padded feature dims (zero padding -> numerically exact).
    Vp = _round_up(V, 128)
    Hp = _round_up(H, 128)
    f32 = jnp.float32
    w1p = jnp.zeros((P, Vp, Hp), f32).at[:, :V, :H].set(w1.reshape(P, V, H))
    b1p = jnp.zeros((1, Hp), f32).at[:, :H].set(b1.reshape(1, H))
    w2p = jnp.zeros((Hp, Hp), f32).at[:H, :H].set(w2)
    b2p = jnp.zeros((1, Hp), f32).at[:, :H].set(b2.reshape(1, H))
    w3p = jnp.zeros((Hp, Hp), f32).at[:H, :H].set(w3)
    b3p = jnp.zeros((1, Hp), f32).at[:, :H].set(b3.reshape(1, H))
    wop = jnp.zeros((Hp, Vp), f32).at[:H, :V].set(wo)
    bop = jnp.zeros((1, Vp), f32).at[:, :V].set(bo.reshape(1, V))

    # Batch tiling: >= 8 sublanes, up to 256 rows per grid step by default.
    if batch_tile is None:
        batch_tile = min(256, _round_up(B, 8))
    TB = _round_up(min(batch_tile, _round_up(B, 8)), 8)
    Bp = _round_up(B, TB)
    tok = jnp.zeros((Bp, P), jnp.int32).at[:B].set(noised)
    grid = (Bp // TB,)

    # Weights: constant index_map -> VMEM-resident across all grid steps.
    def w_spec(shape):
        return pl.BlockSpec(shape, lambda i, s=shape: (0,) * len(s))

    in_specs = [
        pl.BlockSpec((TB, P), lambda i: (i, 0)),       # tokens: tiled over batch
        w_spec((P, Vp, Hp)), w_spec((1, Hp)),
        w_spec((Hp, Hp)),    w_spec((1, Hp)),
        w_spec((Hp, Hp)),    w_spec((1, Hp)),
        w_spec((Hp, Vp)),    w_spec((1, Vp)),
    ]
    out_spec = pl.BlockSpec((TB, Vp), lambda i: (i, 0))

    # VMEM budget: resident weights + double-buffered activation tiles + headroom.
    w_bytes = 4 * (P * Vp * Hp + 2 * Hp * Hp + Hp * Vp + 3 * Hp + Vp)
    act_bytes = 2 * 4 * (TB * P + TB * Vp)             # in/out, double-buffered
    tmp_bytes = 4 * TB * Hp * 6                        # intermediates headroom
    vmem_limit = int(min(max(w_bytes + act_bytes + tmp_bytes + (8 << 20),
                             16 << 20), 56 << 20))     # <= v7x 64 MiB physical

    cost = pl.CostEstimate(
        flops=2 * Bp * (P * Vp * Hp + 2 * Hp * Hp + Hp * Vp),
        transcendentals=0,
        bytes_accessed=w_bytes + 4 * (Bp * P + Bp * Vp),
    )

    out_padded = pl.pallas_call(
        resmlp_kernel,
        out_shape=jax.ShapeDtypeStruct((Bp, Vp), jnp.float32),
        grid=grid,
        in_specs=in_specs,
        out_specs=out_spec,
        compiler_params=pltpu.CompilerParams(
            dimension_semantics=("parallel",),
            vmem_limit_bytes=vmem_limit,
        ),
        cost_estimate=cost,
    )(tok, w1p, b1p, w2p, b2p, w3p, b3p, wop, bop)

    return out_padded[:B, :V]


def init_params(key, window_positions, vocab_size, hidden):
    in_dim = window_positions * vocab_size
    ks = jax.random.split(key, 8)
    scale = lambda fan_in: 1.0 / jnp.sqrt(jnp.float32(fan_in))
    w1 = jax.random.normal(ks[0], (in_dim, hidden), jnp.float32) * scale(in_dim)
    b1 = jax.random.normal(ks[1], (hidden,), jnp.float32) * 0.01
    w2 = jax.random.normal(ks[2], (hidden, hidden), jnp.float32) * scale(hidden)
    b2 = jax.random.normal(ks[3], (hidden,), jnp.float32) * 0.01
    w3 = jax.random.normal(ks[4], (hidden, hidden), jnp.float32) * scale(hidden)
    b3 = jax.random.normal(ks[5], (hidden,), jnp.float32) * 0.01
    wo = jax.random.normal(ks[6], (hidden, vocab_size), jnp.float32) * scale(hidden)
    bo = jax.random.normal(ks[7], (vocab_size,), jnp.float32) * 0.01
    return (w1, b1, w2, b2, w3, b3, wo, bo)


def reference_forward(noised, params, vocab_size):
    """Pure-JAX reference (dense one-hot, matches the PyTorch module)."""
    B = noised.shape[0]
    x = jax.nn.one_hot(noised, vocab_size, dtype=jnp.float32).reshape(B, -1)
    w1, b1, w2, b2, w3, b3, wo, bo = params
    h = jnp.maximum(x @ w1 + b1, 0.0)
    z = jnp.maximum(h @ w2 + b2, 0.0) @ w3 + b3
    r = jnp.maximum(h + z, 0.0)
    return r @ wo + bo


if __name__ == "__main__":
    # Small shapes consistent with the module's forward.
    batch = 16
    window_size = 5          # -> window_size - 1 = 4 noised token positions
    vocab_size = 16
    hidden = 32

    key = jax.random.PRNGKey(0)
    k_tok, k_par = jax.random.split(key)

    noised = jax.random.randint(k_tok, (batch, window_size - 1), 0, vocab_size,
                                dtype=jnp.int32)
    params = init_params(k_par, window_size - 1, vocab_size, hidden)

    # batch_tile=8 forces a 2-step batch grid even at this toy batch size,
    # exercising the pipelined path (default tile is up to 256 rows).
    out = resmlp_forward(noised, params, vocab_size, hidden, batch_tile=8)
    out = jax.block_until_ready(out)

    ref = reference_forward(noised, params, vocab_size)
    assert out.shape == (batch, vocab_size)
    assert jnp.allclose(out, ref, atol=1e-4, rtol=1e-4), (
        float(jnp.max(jnp.abs(out - ref))))

    print("KERNEL_OK")
</pallas_src>

<mosaic_0001>
module attributes {stable_mosaic.version = 11 : i64} {
  func.func @resmlp_kernel(%arg0: i32, %arg1: memref<8x4xi32, #tpu.memory_space<vmem>>, %arg2: memref<4x128x128xf32, #tpu.memory_space<vmem>>, %arg3: memref<1x128xf32, #tpu.memory_space<vmem>>, %arg4: memref<128x128xf32, #tpu.memory_space<vmem>>, %arg5: memref<1x128xf32, #tpu.memory_space<vmem>>, %arg6: memref<128x128xf32, #tpu.memory_space<vmem>>, %arg7: memref<1x128xf32, #tpu.memory_space<vmem>>, %arg8: memref<128x128xf32, #tpu.memory_space<vmem>>, %arg9: memref<1x128xf32, #tpu.memory_space<vmem>>, %arg10: memref<8x128xf32, #tpu.memory_space<vmem>>) attributes {dimension_semantics = [#tpu.dimension_semantics<parallel>], iteration_bounds = array<i64: 2>, scalar_prefetch = 0 : i64, scratch_operands = 0 : i64, tpu.core_type = #tpu.core_type<tc>, window_params = [{transform_indices = @transform_0, window_bounds = array<i64: 8, 4>}, {pipeline_mode = #tpu.pipeline_mode<synchronous>, transform_indices = @transform_1, window_bounds = array<i64: 4, 128, 128>}, {pipeline_mode = #tpu.pipeline_mode<synchronous>, transform_indices = @transform_2, window_bounds = array<i64: 1, 128>}, {pipeline_mode = #tpu.pipeline_mode<synchronous>, transform_indices = @transform_3, window_bounds = array<i64: 128, 128>}, {pipeline_mode = #tpu.pipeline_mode<synchronous>, transform_indices = @transform_4, window_bounds = array<i64: 1, 128>}, {pipeline_mode = #tpu.pipeline_mode<synchronous>, transform_indices = @transform_5, window_bounds = array<i64: 128, 128>}, {pipeline_mode = #tpu.pipeline_mode<synchronous>, transform_indices = @transform_6, window_bounds = array<i64: 1, 128>}, {pipeline_mode = #tpu.pipeline_mode<synchronous>, transform_indices = @transform_7, window_bounds = array<i64: 128, 128>}, {pipeline_mode = #tpu.pipeline_mode<synchronous>, transform_indices = @transform_8, window_bounds = array<i64: 1, 128>}, {transform_indices = @transform_9, window_bounds = array<i64: 8, 128>}]} {
    %c0 = arith.constant 0 : index
    %c0_0 = arith.constant 0 : index
    %0 = vector.load %arg1[%c0, %c0_0] : memref<8x4xi32, #tpu.memory_space<vmem>>, vector<8x4xi32>
    %1 = tpu.iota {dimensions = array<i32: 1>} : vector<8x128xi32>
    %cst = arith.constant 0.000000e+00 : f32
    %2 = vector.broadcast %cst : f32 to vector<8x128xf32>
    %3 = vector.extract_strided_slice %0 {offsets = [0, 0], sizes = [8, 1], strides = [1, 1]} : vector<8x4xi32> to vector<8x1xi32>
    %4 = vector.broadcast %3 : vector<8x1xi32> to vector<8x128xi32>
    %5 = arith.cmpi eq, %1, %4 : vector<8x128xi32>
    %6 = arith.extui %5 : vector<8x128xi1> to vector<8x128xi32>
    %7 = arith.sitofp %6 : vector<8x128xi32> to vector<8x128xf32>
    %c0_1 = arith.constant 0 : index
    %c0_2 = arith.constant 0 : index
    %c0_3 = arith.constant 0 : index
    %8 = vector.load %arg2[%c0_1, %c0_2, %c0_3] : memref<4x128x128xf32, #tpu.memory_space<vmem>>, vector<1x128x128xf32>
    %9 = vector.shape_cast %8 : vector<1x128x128xf32> to vector<128x128xf32>
    %cst_4 = arith.constant dense<0.000000e+00> : vector<8x128xf32>
    %10 = tpu.matmul %7, %9, %cst_4 {dimension_numbers = #tpu.dot_dimension_numbers<[1], [0], [0], [1], [0, 0, 1, 1], [], []>} : vector<8x128xf32>, vector<128x128xf32>, vector<8x128xf32> -> vector<8x128xf32>
    %11 = arith.addf %2, %10 : vector<8x128xf32>
    %12 = vector.extract_strided_slice %0 {offsets = [0, 1], sizes = [8, 1], strides = [1, 1]} : vector<8x4xi32> to vector<8x1xi32>
    %13 = vector.broadcast %12 : vector<8x1xi32> to vector<8x128xi32>
    %14 = arith.cmpi eq, %1, %13 : vector<8x128xi32>
    %15 = arith.extui %14 : vector<8x128xi1> to vector<8x128xi32>
    %16 = arith.sitofp %15 : vector<8x128xi32> to vector<8x128xf32>
    %c1 = arith.constant 1 : index
    %c0_5 = arith.constant 0 : index
    %c0_6 = arith.constant 0 : index
    %17 = vector.load %arg2[%c1, %c0_5, %c0_6] : memref<4x128x128xf32, #tpu.memory_space<vmem>>, vector<1x128x128xf32>
    %18 = vector.shape_cast %17 : vector<1x128x128xf32> to vector<128x128xf32>
    %cst_7 = arith.constant dense<0.000000e+00> : vector<8x128xf32>
    %19 = tpu.matmul %16, %18, %cst_7 {dimension_numbers = #tpu.dot_dimension_numbers<[1], [0], [0], [1], [0, 0, 1, 1], [], []>} : vector<8x128xf32>, vector<128x128xf32>, vector<8x128xf32> -> vector<8x128xf32>
    %20 = arith.addf %11, %19 : vector<8x128xf32>
    %21 = vector.extract_strided_slice %0 {offsets = [0, 2], sizes = [8, 1], strides = [1, 1]} : vector<8x4xi32> to vector<8x1xi32>
    %22 = vector.broadcast %21 : vector<8x1xi32> to vector<8x128xi32>
    %23 = arith.cmpi eq, %1, %22 : vector<8x128xi32>
    %24 = arith.extui %23 : vector<8x128xi1> to vector<8x128xi32>
    %25 = arith.sitofp %24 : vector<8x128xi32> to vector<8x128xf32>
    %c2 = arith.constant 2 : index
    %c0_8 = arith.constant 0 : index
    %c0_9 = arith.constant 0 : index
    %26 = vector.load %arg2[%c2, %c0_8, %c0_9] : memref<4x128x128xf32, #tpu.memory_space<vmem>>, vector<1x128x128xf32>
    %27 = vector.shape_cast %26 : vector<1x128x128xf32> to vector<128x128xf32>
    %cst_10 = arith.constant dense<0.000000e+00> : vector<8x128xf32>
    %28 = tpu.matmul %25, %27, %cst_10 {dimension_numbers = #tpu.dot_dimension_numbers<[1], [0], [0], [1], [0, 0, 1, 1], [], []>} : vector<8x128xf32>, vector<128x128xf32>, vector<8x128xf32> -> vector<8x128xf32>
    %29 = arith.addf %20, %28 : vector<8x128xf32>
    %30 = vector.extract_strided_slice %0 {offsets = [0, 3], sizes = [8, 1], strides = [1, 1]} : vector<8x4xi32> to vector<8x1xi32>
    %31 = vector.broadcast %30 : vector<8x1xi32> to vector<8x128xi32>
    %32 = arith.cmpi eq, %1, %31 : vector<8x128xi32>
    %33 = arith.extui %32 : vector<8x128xi1> to vector<8x128xi32>
    %34 = arith.sitofp %33 : vector<8x128xi32> to vector<8x128xf32>
    %c3 = arith.constant 3 : index
    %c0_11 = arith.constant 0 : index
    %c0_12 = arith.constant 0 : index
    %35 = vector.load %arg2[%c3, %c0_11, %c0_12] : memref<4x128x128xf32, #tpu.memory_space<vmem>>, vector<1x128x128xf32>
    %36 = vector.shape_cast %35 : vector<1x128x128xf32> to vector<128x128xf32>
    %cst_13 = arith.constant dense<0.000000e+00> : vector<8x128xf32>
    %37 = tpu.matmul %34, %36, %cst_13 {dimension_numbers = #tpu.dot_dimension_numbers<[1], [0], [0], [1], [0, 0, 1, 1], [], []>} : vector<8x128xf32>, vector<128x128xf32>, vector<8x128xf32> -> vector<8x128xf32>
    %38 = arith.addf %29, %37 : vector<8x128xf32>
    %c0_14 = arith.constant 0 : index
    %c0_15 = arith.constant 0 : index
    %39 = vector.load %arg3[%c0_14, %c0_15] : memref<1x128xf32, #tpu.memory_space<vmem>>, vector<1x128xf32>
    %40 = vector.broadcast %39 : vector<1x128xf32> to vector<8x128xf32>
    %41 = arith.addf %38, %40 : vector<8x128xf32>
    %cst_16 = arith.constant 0.000000e+00 : f32
    %42 = vector.broadcast %cst_16 : f32 to vector<8x128xf32>
    %43 = arith.maximumf %41, %42 : vector<8x128xf32>
    %c0_17 = arith.constant 0 : index
    %c0_18 = arith.constant 0 : index
    %44 = vector.load %arg4[%c0_17, %c0_18] : memref<128x128xf32, #tpu.memory_space<vmem>>, vector<128x128xf32>
    %cst_19 = arith.constant dense<0.000000e+00> : vector<8x128xf32>
    %45 = tpu.matmul %43, %44, %cst_19 {dimension_numbers = #tpu.dot_dimension_numbers<[1], [0], [0], [1], [0, 0, 1, 1], [], []>} : vector<8x128xf32>, vector<128x128xf32>, vector<8x128xf32> -> vector<8x128xf32>
    %c0_20 = arith.constant 0 : index
    %c0_21 = arith.constant 0 : index
    %46 = vector.load %arg5[%c0_20, %c0_21] : memref<1x128xf32, #tpu.memory_space<vmem>>, vector<1x128xf32>
    %47 = vector.broadcast %46 : vector<1x128xf32> to vector<8x128xf32>
    %48 = arith.addf %45, %47 : vector<8x128xf32>
    %cst_22 = arith.constant 0.000000e+00 : f32
    %49 = vector.broadcast %cst_22 : f32 to vector<8x128xf32>
    %50 = arith.maximumf %48, %49 : vector<8x128xf32>
    %c0_23 = arith.constant 0 : index
    %c0_24 = arith.constant 0 : index
    %51 = vector.load %arg6[%c0_23, %c0_24] : memref<128x128xf32, #tpu.memory_space<vmem>>, vector<128x128xf32>
    %cst_25 = arith.constant dense<0.000000e+00> : vector<8x128xf32>
    %52 = tpu.matmul %50, %51, %cst_25 {dimension_numbers = #tpu.dot_dimension_numbers<[1], [0], [0], [1], [0, 0, 1, 1], [], []>} : vector<8x128xf32>, vector<128x128xf32>, vector<8x128xf32> -> vector<8x128xf32>
    %c0_26 = arith.constant 0 : index
    %c0_27 = arith.constant 0 : index
    %53 = vector.load %arg7[%c0_26, %c0_27] : memref<1x128xf32, #tpu.memory_space<vmem>>, vector<1x128xf32>
    %54 = vector.broadcast %53 : vector<1x128xf32> to vector<8x128xf32>
    %55 = arith.addf %52, %54 : vector<8x128xf32>
    %56 = arith.addf %43, %55 : vector<8x128xf32>
    %cst_28 = arith.constant 0.000000e+00 : f32
    %57 = vector.broadcast %cst_28 : f32 to vector<8x128xf32>
    %58 = arith.maximumf %56, %57 : vector<8x128xf32>
    %c0_29 = arith.constant 0 : index
    %c0_30 = arith.constant 0 : index
    %59 = vector.load %arg8[%c0_29, %c0_30] : memref<128x128xf32, #tpu.memory_space<vmem>>, vector<128x128xf32>
    %cst_31 = arith.constant dense<0.000000e+00> : vector<8x128xf32>
    %60 = tpu.matmul %58, %59, %cst_31 {dimension_numbers = #tpu.dot_dimension_numbers<[1], [0], [0], [1], [0, 0, 1, 1], [], []>} : vector<8x128xf32>, vector<128x128xf32>, vector<8x128xf32> -> vector<8x128xf32>
    %c0_32 = arith.constant 0 : index
    %c0_33 = arith.constant 0 : index
    %61 = vector.load %arg9[%c0_32, %c0_33] : memref<1x128xf32, #tpu.memory_space<vmem>>, vector<1x128xf32>
    %62 = vector.broadcast %61 : vector<1x128xf32> to vector<8x128xf32>
    %63 = arith.addf %60, %62 : vector<8x128xf32>
    %c0_34 = arith.constant 0 : index
    %c0_35 = arith.constant 0 : index
    %64 = vector.load %arg10[%c0_34, %c0_35] : memref<8x128xf32, #tpu.memory_space<vmem>>, vector<8x128xf32>
    tpu.vector_store %arg10[%c0_34, %c0_35], %63 {strides = array<i32>} : memref<8x128xf32, #tpu.memory_space<vmem>>, vector<8x128xf32>,
    return
  }
  func.func @transform_0(%arg0: i32) -> (i32, i32) {
    %c0_i32 = arith.constant 0 : i32
    %c0_i32_0 = arith.constant 0 : i32
    return %arg0, %c0_i32 : i32, i32
  }
  func.func @transform_1(%arg0: i32) -> (i32, i32, i32) {
    %c0_i32 = arith.constant 0 : i32
    %c0_i32_0 = arith.constant 0 : i32
    %c0_i32_1 = arith.constant 0 : i32
    %c0_i32_2 = arith.constant 0 : i32
    return %c0_i32, %c0_i32_0, %c0_i32_1 : i32, i32, i32
  }
  func.func @transform_2(%arg0: i32) -> (i32, i32) {
    %c0_i32 = arith.constant 0 : i32
    %c0_i32_0 = arith.constant 0 : i32
    %c0_i32_1 = arith.constant 0 : i32
    return %c0_i32, %c0_i32_0 : i32, i32
  }
  func.func @transform_3(%arg0: i32) -> (i32, i32) {
    %c0_i32 = arith.constant 0 : i32
    %c0_i32_0 = arith.constant 0 : i32
    %c0_i32_1 = arith.constant 0 : i32
    return %c0_i32, %c0_i32_0 : i32, i32
  }
  func.func @transform_4(%arg0: i32) -> (i32, i32) {
    %c0_i32 = arith.constant 0 : i32
    %c0_i32_0 = arith.constant 0 : i32
    %c0_i32_1 = arith.constant 0 : i32
    return %c0_i32, %c0_i32_0 : i32, i32
  }
  func.func @transform_5(%arg0: i32) -> (i32, i32) {
    %c0_i32 = arith.constant 0 : i32
    %c0_i32_0 = arith.constant 0 : i32
    %c0_i32_1 = arith.constant 0 : i32
    return %c0_i32, %c0_i32_0 : i32, i32
  }
  func.func @transform_6(%arg0: i32) -> (i32, i32) {
    %c0_i32 = arith.constant 0 : i32
    %c0_i32_0 = arith.constant 0 : i32
    %c0_i32_1 = arith.constant 0 : i32
    return %c0_i32, %c0_i32_0 : i32, i32
  }
  func.func @transform_7(%arg0: i32) -> (i32, i32) {
    %c0_i32 = arith.constant 0 : i32
    %c0_i32_0 = arith.constant 0 : i32
    %c0_i32_1 = arith.constant 0 : i32
    return %c0_i32, %c0_i32_0 : i32, i32
  }
  func.func @transform_8(%arg0: i32) -> (i32, i32) {
    %c0_i32 = arith.constant 0 : i32
    %c0_i32_0 = arith.constant 0 : i32
    %c0_i32_1 = arith.constant 0 : i32
    return %c0_i32, %c0_i32_0 : i32, i32
  }
  func.func @transform_9(%arg0: i32) -> (i32, i32) {
    %c0_i32 = arith.constant 0 : i32
    %c0_i32_0 = arith.constant 0 : i32
    return %arg0, %c0_i32 : i32, i32
  }
}

</mosaic_0001>

<bundles_post_ra>
// kernel: tpu_custom_call.1
= control target key start
LH: loop header
LB: loop body
LE: loop exit
PB: predicated region body
PF: predicated region fallthrough
CT: control target
= control target key end

     0   :  { %14 = vsyncpa [#allocation3], 0  ;;  %s2222_s0 = inlined_call_operand.vmem [shape: s32[16,4], index: 0, kind: input, shape index: {}]   ;;  %s2223_s1 = inlined_call_operand.hbm [shape: f32[4,128,128], index: 1, kind: input, shape index: {}]   ;;  %s2224_s2 = inlined_call_operand.vmem [shape: f32[1,128], index: 2, kind: input, shape index: {}]   ;;  %s2225_s3 = inlined_call_operand.hbm [shape: f32[128,128], index: 3, kind: input, shape index: {}]   ;;  %s2226_s4 = inlined_call_operand.vmem [shape: f32[1,128], index: 4, kind: input, shape index: {}]   ;;  %s2227_s5 = inlined_call_operand.hbm [shape: f32[128,128], index: 5, kind: input, shape index: {}]   ;;  %s2228_s6 = inlined_call_operand.vmem [shape: f32[1,128], index: 6, kind: input, shape index: {}]   ;;  %s2229_s7 = inlined_call_operand.hbm [shape: f32[128,128], index: 7, kind: input, shape index: {}]   ;;  %s2230_s8 = inlined_call_operand.vmem [shape: f32[1,128], index: 8, kind: input, shape index: {}]   ;;  %s2231_s9 = inlined_call_operand.hbm [shape: f32[16,128], index: 9, kind: output, shape index: {}]  }
   0x1   :  { %15 = vsyncpa [#allocation6], 0 }
   0x2   :  { %16 = vsyncpa [#allocation9], 0 }
   0x3   :  { %17 = vsyncpa [#allocation4], 0 }
   0x4   :  { %19 = vsyncpa [#allocation4 + $0x1], 0  ;;  %s1899_s30 = smov 0   ;;  %s1901_s10 = smov 0  }
   0x5   :  { %s1903_s11 = smov 0   ;;  %s1905_s12 = smov 0  }
   0x6 LB: > { %s1920_s13 = sadd.s32 4294967295, %s1833_s12   ;;  %s1169_s14 = sadd.s32 4294967294, %s1833_s12   ;;  %s1833_s12 = sphi %s1905_s12, %s2239_s12   ;;  %s1829_s11 = sphi %s1903_s11, %s2238_s11   ;;  %s1825_s10 = sphi %s1901_s10, %s2237_s10   ;;  %s1821_s30 = sphi %s1899_s30, %s2236_s30  }
   0x7   : > { %s1924_s15 = sadd.s32 1, %s1833_s12   ;;  %s226_s16 = sadd.s32 1, %s1829_s11 }
   0x8   : > { %s223_s17 = ssub.s32 %s1833_s12, %s1924_s15  ;;  %p236_p0 = scmp.ne.s32.totalorder %s1829_s11, %s1825_s10 }
   0x9   : > { %p224_p1 = scmp.eq.s32.totalorder %s223_s17, 0  ;;  %p237_p2 = scmp.eq.s32.totalorder %s1920_s13, 1 }
   0xa   : > { %p242_p3 = scmp.ne.s32.totalorder %s1825_s10, %s1821_s30  ;;  %p243_p4 = scmp.eq.s32.totalorder %s1169_s14, 1 }
   0xb   : > { %s1935_s18 = scalar_select %p224_p1, %s1829_s11, %s226_s16  }
   0xc   : > { %p1937_p5 = por %p237_p2, %p236_p0  ;;  %p1941_p6 = por %p243_p4, %p242_p3 }
   0xd   : > { %p1170_p7 = scmp.ge.s32.totalorder %s1833_s12, 1  ;;  %p250_p8 = scmp.lt.s32.totalorder %s1833_s12, 3 }
   0xe   : > { %p1598_p9 = scmp.eq.s32.totalorder %s1920_s13, 0  ;;  %s1835_s22 = smov [#allocation5]  }
   0xf   : > { %p1948_p10 = pnand %p1170_p7, %p250_p8  ;;  %s278_s23 = sshll.u32 %s1835_s22, 4  ;;  %s279_s23 = int_to_ptr.vmem [resolvable:$true] %s278_s23 }
  0x10   : > { %s1836_s25 = smov [#allocation2]   ;;  %s1837_s27 = smov [#allocation7]  }
  0x11   : > { %p1581_p11 = pneg %p1948_p10  ;;  %s262_s26 = sshll.u32 %s1836_s25, 4  ;;  %s263_s26 = int_to_ptr.vmem [resolvable:$true] %s262_s26 }
  0x12   : > { %s294_s28 = sshll.u32 %s1837_s27, 4  ;;  %s1668_s29 = scalar_lea.vmem %s279_s23, 2048  ;;  %s295_s28 = int_to_ptr.vmem [resolvable:$true] %s294_s28 }
  0x13   : > { %p1956_p12 = pnand %p1598_p9, %p1581_p11  ;;  %p1669_p0 = scmp.ne.s32.totalorder %s279_s23, %s1668_s29 }
  0x14   : > { %p1676_p3 = scmp.lt.s32.totalorder %s279_s23, %s279_s23  ;;  %p1677_p4 = scmp.lt.s32.totalorder %s1668_s29, %s1668_s29 }
  0x15   : > { %p1659_p13 = pneg %p1956_p12 }
  0x16   : > { %p1678_p7 = por %p1677_p4, %p1676_p3 }
  0x17   : > { %p1671_p1 = pnand %p1669_p0, %p1659_p13 }
  0x19   : > { %p1672_p2 = pneg %p1671_p1 }
  0x1b   : > { %p1679_p8 = pnand %p1678_p7, %p1672_p2 }
  0x1d   : > { %1682 = shalt.err (!%p1679_p8)
}
  0x1e   : > { %s1838_s14 = smov 128   ;;  %s1839_s16 = smov 8  }
  0x1f   : > { %1587 = dma.hbm_to_vmem [thread:$0]  (!%p1956_p12), %s2225_s3, 2048, %s279_s23, [#allocation6], %s1838_s14, %s1838_s14, %s1839_s16  }
  0x20   : > { %s1694_s25 = scalar_lea.vmem %s263_s26, 8192  ;;  %p1702_p2 = scmp.lt.s32.totalorder %s263_s26, %s263_s26 }
  0x21   : > { %p1695_p11 = scmp.ne.s32.totalorder %s263_s26, %s1694_s25  ;;  %p1703_p3 = scmp.lt.s32.totalorder %s1694_s25, %s1694_s25 }
  0x23   : > { %p1697_p0 = pnand %p1695_p11, %p1659_p13  ;;  %p1704_p4 = por %p1703_p3, %p1702_p2 }
  0x25   : > { %p1698_p1 = pneg %p1697_p0 }
  0x27   : > { %p1705_p7 = pnand %p1704_p4, %p1698_p1 }
  0x29   : > { %1708 = shalt.err (!%p1705_p7)
}
  0x2a   : > { %1584 = dma.hbm_to_vmem [thread:$0]  (!%p1956_p12), %s2223_s1, 8192, %s263_s26, [#allocation3], %s1838_s14, %s1838_s14, %s1839_s16  }
  0x2b   : > { %s1720_s23 = scalar_lea.vmem %s295_s28, 2048  ;;  %p1728_p2 = scmp.lt.s32.totalorder %s295_s28, %s295_s28 }
  0x2c   : > { %p1721_p8 = scmp.ne.s32.totalorder %s295_s28, %s1720_s23  ;;  %p1729_p1 = scmp.lt.s32.totalorder %s1720_s23, %s1720_s23 }
  0x2e   : > { %p1723_p11 = pnand %p1721_p8, %p1659_p13  ;;  %p1730_p3 = por %p1729_p1, %p1728_p2 }
  0x30   : > { %p1724_p0 = pneg %p1723_p11 }
  0x32   : > { %p1731_p4 = pnand %p1730_p3, %p1724_p0 }
  0x34   : > { %1734 = shalt.err (!%p1731_p4)
}
  0x35   : > { %1590 = dma.hbm_to_vmem [thread:$0]  (!%p1956_p12), %s2227_s5, 2048, %s295_s28, [#allocation6], %s1838_s14, %s1838_s14, %s1839_s16  }
  0x36   : > { %s1840_s26 = smov [#allocation8]  }
  0x37   : > { %s310_s25 = sshll.u32 %s1840_s26, 4  ;;  %s311_s25 = int_to_ptr.vmem [resolvable:$true] %s310_s25 }
  0x38   : > { %s1746_s27 = scalar_lea.vmem %s311_s25, 2048  ;;  %p1754_p0 = scmp.lt.s32.totalorder %s311_s25, %s311_s25 }
  0x39   : > { %p1747_p7 = scmp.ne.s32.totalorder %s311_s25, %s1746_s27  ;;  %p1755_p2 = scmp.lt.s32.totalorder %s1746_s27, %s1746_s27 }
  0x3b   : > { %p1749_p8 = pnand %p1747_p7, %p1659_p13  ;;  %p1756_p1 = por %p1755_p2, %p1754_p0 }
  0x3d   : > { %p1750_p11 = pneg %p1749_p8 }
  0x3f   : > { %p1757_p3 = pnand %p1756_p1, %p1750_p11 }
  0x41   : > { %1760 = shalt.err (!%p1757_p3)
}
  0x42   : > { %1593 = dma.hbm_to_vmem [thread:$0]  (!%p1956_p12), %s2229_s7, 2048, %s311_s25, [#allocation9], %s1838_s14, %s1838_s14, %s1839_s16  }
  0x43   : > { %336 = sbr.rel (%p1948_p10) target bundleno = 1049 (0x419), region = 56 }
  0x48   : > { %1804 = dma.done.wait (%p1598_p9), [#allocation3], 8192  }
  0x49   : > { %1806 = vsyncadd (%p1598_p9), [#allocation3], 4294959104 }
  0x4a   : > { %1808 = dma.done.wait (%p1598_p9), [#allocation6], 4096  }
  0x4b   : > { %1810 = vsyncadd (%p1598_p9), [#allocation6], 4294963200 }
  0x4c   : > { %1812 = dma.done.wait (%p1598_p9), [#allocation9], 2048  }
  0x4d   : > { %1814 = vsyncadd (%p1598_p9), [#allocation9], 4294965248  ;;  %p383_p10 = scmp.lt.s32.totalorder %s1920_s13, 1  ;;  %v1841_v0 = vmov 1   ;;  %v1842_v1 = vmov 2   ;;  %v1843_v2 = vmov 0.0   ;;  %v388_v38 = vlaneseq }
  0x4e   : > { %1652 = vset.pattern.permute.xlu0 %v1841_v0  ;;  %1654 = vset.pattern.permute.xlu1 %v1842_v1  ;;  %vm1844_vm0 = vmmov 0   ;;  %v434_v4 = vld [vmem:[#allocation2 + $0xf8] sm:$0xff]  ;;  %v433_v5 = vld [vmem:[#allocation2 + $0xf0] sm:$0xff]  ;;  %v1845_v8 = vmov 0   ;;  %v1846_v9 = vmov 3   ;;  %v432_v10 = vld [vmem:[#allocation2 + $0xe8] sm:$0xff] }
  0x4f   : > { %s384_s21 = scalar_select %p383_p10, %s1920_s13, 1  ;;  %1318 = vmatprep.subr.mxu0 %v1843_v2  ;;  %1353 = vmatprep.subr.mxu1 %v1843_v2  ;;  %v411_v6 = vld [vmem:[#allocation2 + $0x78] sm:$0xff]  ;;  %v410_v7 = vld [vmem:[#allocation2 + $0x70] sm:$0xff]  ;;  %v409_v11 = vld [vmem:[#allocation2 + $0x68] sm:$0xff]  ;;  %v2065_v39 = vand.u32 127, %v388_v38  ;;  %v1847_v42 = vmov 1.0  }
  0x50   : > { %1350 = vmatprep.mubr.msk.f32.mxu0 %vm1844_vm0, %v1843_v2  ;;  %1385 = vmatprep.mubr.msk.f32.mxu1 %vm1844_vm0, %v1843_v2  ;;  %v431_v12 = vld [vmem:[#allocation2 + $0xe0] sm:$0xff]  ;;  %v430_v14 = vld [vmem:[#allocation2 + $0xd8] sm:$0xff]  ;;  %v429_v16 = vld [vmem:[#allocation2 + $0xd0] sm:$0xff]  ;;  %s380_s29 = sand.u32 1, %s1825_s10   ;;  %s1196_s16 = sshll.u32 %s1920_s13, 7 }
  0x51   : > { %s1182_s24 = sshll.u32 %s384_s21, 3  ;;  %1319 = vmatpush3.msra.mxu0 %v434_v4  ;;  %1354 = vmatpush3.msra.mxu1 %v411_v6  ;;  %v408_v13 = vld [vmem:[#allocation2 + $0x60] sm:$0xff]  ;;  %v407_v15 = vld [vmem:[#allocation2 + $0x58] sm:$0xff]  ;;  %v406_v17 = vld [vmem:[#allocation2 + $0x50] sm:$0xff]  ;;  %s1181_s21 = sshll.u32 %s380_s29, 3 }
  0x52   : > { %s386_s23 = scalar_lea.vmem %s2222_s0, %s1182_s24  ;;  %1320 = vmatprep.subr.mxu0 %v1843_v2  ;;  %1355 = vmatprep.subr.mxu1 %v1843_v2  ;;  %v428_v18 = vld [vmem:[#allocation2 + $0xc8] sm:$0xff]  ;;  %v427_v20 = vld [vmem:[#allocation2 + $0xc0] sm:$0xff]  ;;  %v426_v22 = vld [vmem:[#allocation2 + $0xb8] sm:$0xff]  ;;  %s2187_s25 = scalar_lea.hbm %s2231_s9, %s1196_s16 }
  0x53   : > { %v387_v3 = vld [vmem:[%s386_s23] sm:$0xff]  ;;  %1321 = vmatpush3.msra.mxu0 %v433_v5  ;;  %1356 = vmatpush3.msra.mxu1 %v410_v7  ;;  %v405_v19 = vld [vmem:[#allocation2 + $0x48] sm:$0xff]  ;;  %v403_v23 = vld [vmem:[#allocation2 + $0x38] sm:$0xff]  ;;  %s382_s23 = scalar_lea.vmem [#allocation10], %s1181_s21  ;;  %s1056_s27 = scalar_lea.sflag [#allocation4], %s380_s29 }
  0x54   : > { %413 = vperm.xlu0 %1652, %v387_v3   ;;  %576 = vperm.xlu1 %1654, %v387_v3   ;;  %v404_v21 = vld [vmem:[#allocation2 + $0x40] sm:$0xff]  ;;  %v425_v24 = vld [vmem:[#allocation2 + $0xb0] sm:$0xff]  ;;  %v424_v26 = vld [vmem:[#allocation2 + $0xa8] sm:$0xff]  ;;  %s1069_s17 = sshll.u32 %s382_s23, 4  ;;  %s1848_s24 = smov [#allocation10]   ;;  %s1070_s17 = int_to_ptr.vmem [resolvable:$true] %s1069_s17 }
  0x55   : > { %1322 = vmatprep.subr.mxu0 %v1843_v2  ;;  %1357 = vmatprep.subr.mxu1 %v1843_v2  ;;  %v402_v25 = vld [vmem:[#allocation2 + $0x30] sm:$0xff]  ;;  %v401_v27 = vld [vmem:[#allocation2 + $0x28] sm:$0xff]  ;;  %v423_v28 = vld [vmem:[#allocation2 + $0xa0] sm:$0xff]  ;;  %s1761_s28 = scalar_lea.vmem %s1070_s17, 128  ;;  %s1765_s13 = sshll.u32 %s1848_s24, 4  ;;  %s1766_s13 = int_to_ptr.vmem [resolvable:$false] %s1765_s13 }
  0x56   : > { %1323 = vmatpush3.msra.mxu0 %v432_v10  ;;  %1358 = vmatpush3.msra.mxu1 %v409_v11  ;;  %v400_v29 = vld [vmem:[#allocation2 + $0x20] sm:$0xff]  ;;  %v422_v30 = vld [vmem:[#allocation2 + $0x98] sm:$0xff]  ;;  %v421_v32 = vld [vmem:[#allocation2 + $0x90] sm:$0xff]  ;;  %p1762_p9 = scmp.ne.s32.totalorder %s1070_s17, %s1761_s28  ;;  %s1767_s21 = scalar_lea.vmem %s1766_s13, 256 }
  0x57   : > { %1324 = vmatprep.subr.mxu0 %v1843_v2  ;;  %1359 = vmatprep.subr.mxu1 %v1843_v2  ;;  %v399_v31 = vld [vmem:[#allocation2 + $0x18] sm:$0xff]  ;;  %v398_v33 = vld [vmem:[#allocation2 + $0x10] sm:$0xff]  ;;  %v420_v34 = vld [vmem:[#allocation2 + $0x88] sm:$0xff]  ;;  %p1768_p4 = scmp.lt.s32.totalorder %s1070_s17, %s1766_s13  ;;  %p1769_p7 = scmp.lt.s32.totalorder %s1767_s21, %s1761_s28 }
  0x58   : > { %1653 = vset.pattern.permute.xlu0 %v1845_v8  ;;  %1655 = vset.pattern.permute.xlu1 %v1846_v9  ;;  %v397_v35 = vld [vmem:[#allocation2 + $0x8] sm:$0xff]  ;;  %v419_v36 = vld [vmem:[#allocation2 + $0x80] sm:$0xff]  ;;  %v597_v41 = vld [vmem:[#allocation2 + $0x178] sm:$0xff]  ;;  %p1763_p12 = pnand %p1762_p9, %p1937_p5 }
  0x59   : > { %391 = vperm.xlu0 %1653, %v387_v3   ;;  %670 = vperm.xlu1 %1655, %v387_v3   ;;  %v396_v37 = vld [vmem:[#allocation2] sm:$0xff]  ;;  %v596_v43 = vld [vmem:[#allocation2 + $0x170] sm:$0xff]  ;;  %v595_v44 = vld [vmem:[#allocation2 + $0x168] sm:$0xff]  ;;  %p1770_p8 = por %p1769_p7, %p1768_p4 }
  0x5a   : > { %1325 = vmatpush3.msra.mxu0 %v431_v12  ;;  %1360 = vmatpush3.msra.mxu1 %v408_v13  ;;  %v691_v46 = vld [vmem:[#allocation2 + $0x1f8] sm:$0xff]  ;;  %v594_v47 = vld [vmem:[#allocation2 + $0x160] sm:$0xff]  ;;  %v690_v48 = vld [vmem:[#allocation2 + $0x1f0] sm:$0xff]  ;;  %p1764_p13 = pneg %p1763_p12 }
  0x5b   : > { %1326 = vmatprep.subr.mxu0 %v1843_v2  ;;  %1361 = vmatprep.subr.mxu1 %v1843_v2  ;;  %v593_v49 = vld [vmem:[#allocation2 + $0x158] sm:$0xff]  ;;  %v689_v50 = vld [vmem:[#allocation2 + $0x1e8] sm:$0xff]  ;;  %v592_v51 = vld [vmem:[#allocation2 + $0x150] sm:$0xff] }
  0x5c   : > { %1327 = vmatpush3.msra.mxu0 %v430_v14  ;;  %1362 = vmatpush3.msra.mxu1 %v407_v15  ;;  %v688_v52 = vld [vmem:[#allocation2 + $0x1e0] sm:$0xff]  ;;  %v591_v53 = vld [vmem:[#allocation2 + $0x148] sm:$0xff]  ;;  %v687_v54 = vld [vmem:[#allocation2 + $0x1d8] sm:$0xff]  ;;  %p1771_p11 = pnand %p1770_p8, %p1764_p13 }
  0x5d   : > { %1328 = vmatprep.subr.mxu0 %v1843_v2  ;;  %1363 = vmatprep.subr.mxu1 %v1843_v2  ;;  %v590_v55 = vld [vmem:[#allocation2 + $0x140] sm:$0xff]  ;;  %v686_v56 = vld [vmem:[#allocation2 + $0x1d0] sm:$0xff]  ;;  %v589_v57 = vld [vmem:[#allocation2 + $0x138] sm:$0xff] }
  0x5e   : > { %1329 = vmatpush3.msra.mxu0 %v429_v16  ;;  %1364 = vmatpush3.msra.mxu1 %v406_v17  ;;  %v685_v58 = vld [vmem:[#allocation2 + $0x1c8] sm:$0xff]  ;;  %v588_v59 = vld [vmem:[#allocation2 + $0x130] sm:$0xff]  ;;  %v684_v60 = vld [vmem:[#allocation2 + $0x1c0] sm:$0xff] }
  0x5f   : > { %1330 = vmatprep.subr.mxu0 %v1843_v2  ;;  %1365 = vmatprep.subr.mxu1 %v1843_v2  ;;  %v587_v61 = vld [vmem:[#allocation2 + $0x128] sm:$0xff]  ;;  %v683_v62 = vld [vmem:[#allocation2 + $0x1b8] sm:$0xff]  ;;  %v586_v63 = vld [vmem:[#allocation2 + $0x120] sm:$0xff] }
  0x60   : > { %1331 = vmatpush3.msra.mxu0 %v428_v18  ;;  %1366 = vmatpush3.msra.mxu1 %v405_v19  ;;  %v682_v0 = vld [vmem:[#allocation2 + $0x1b0] sm:$0xff]  ;;  %v585_v1 = vld [vmem:[#allocation2 + $0x118] sm:$0xff]  ;;  %v681_v3 = vld [vmem:[#allocation2 + $0x1a8] sm:$0xff] }
  0x61   : > { %1332 = vmatprep.subr.mxu0 %v1843_v2  ;;  %1367 = vmatprep.subr.mxu1 %v1843_v2  ;;  %v584_v4 = vld [vmem:[#allocation2 + $0x110] sm:$0xff]  ;;  %v680_v5 = vld [vmem:[#allocation2 + $0x1a0] sm:$0xff]  ;;  %v583_v7 = vld [vmem:[#allocation2 + $0x108] sm:$0xff] }
  0x62   : > { %1333 = vmatpush3.msra.mxu0 %v427_v20  ;;  %1368 = vmatpush3.msra.mxu1 %v404_v21  ;;  %v679_v8 = vld [vmem:[#allocation2 + $0x198] sm:$0xff]  ;;  %v678_v10 = vld [vmem:[#allocation2 + $0x190] sm:$0xff]  ;;  %v677_v11 = vld [vmem:[#allocation2 + $0x188] sm:$0xff] }
  0x63   : > { %1334 = vmatprep.subr.mxu0 %v1843_v2  ;;  %1369 = vmatprep.subr.mxu1 %v1843_v2  ;;  %v676_v13 = vld [vmem:[#allocation2 + $0x180] sm:$0xff]  ;;  %v787_v14 = vld [vmem:[#allocation5 + $0x78] sm:$0xff]  ;;  %v786_v15 = vld [vmem:[#allocation5 + $0x70] sm:$0xff] }
  0x64   : > { %1335 = vmatpush3.msra.mxu0 %v426_v22  ;;  %1370 = vmatpush3.msra.mxu1 %v403_v23  ;;  %v785_v16 = vld [vmem:[#allocation5 + $0x68] sm:$0xff]  ;;  %v784_v17 = vld [vmem:[#allocation5 + $0x60] sm:$0xff]  ;;  %v783_v18 = vld [vmem:[#allocation5 + $0x58] sm:$0xff] }
  0x65   : > { %1336 = vmatprep.subr.mxu0 %v1843_v2  ;;  %1371 = vmatprep.subr.mxu1 %v1843_v2  ;;  %v782_v19 = vld [vmem:[#allocation5 + $0x50] sm:$0xff]  ;;  %v781_v20 = vld [vmem:[#allocation5 + $0x48] sm:$0xff]  ;;  %v780_v21 = vld [vmem:[#allocation5 + $0x40] sm:$0xff] }
  0x66   : > { %1337 = vmatpush3.msra.mxu0 %v425_v24  ;;  %1372 = vmatpush3.msra.mxu1 %v402_v25  ;;  %v779_v22 = vld [vmem:[#allocation5 + $0x38] sm:$0xff]  ;;  %v778_v23 = vld [vmem:[#allocation5 + $0x30] sm:$0xff]  ;;  %v777_v24 = vld [vmem:[#allocation5 + $0x28] sm:$0xff] }
  0x67   : > { %1338 = vmatprep.subr.mxu0 %v1843_v2  ;;  %1373 = vmatprep.subr.mxu1 %v1843_v2  ;;  %v776_v25 = vld [vmem:[#allocation5 + $0x20] sm:$0xff]  ;;  %v873_v38 = vld [vmem:[#allocation7 + $0x38] sm:$0xff] }
  0x68   : > { %1339 = vmatpush3.msra.mxu0 %v424_v26  ;;  %1374 = vmatpush3.msra.mxu1 %v401_v27  ;;  %v775_v26 = vld [vmem:[#allocation5 + $0x18] sm:$0xff]  ;;  %v774_v27 = vld [vmem:[#allocation5 + $0x10] sm:$0xff] }
  0x69   : > { %1340 = vmatprep.subr.mxu0 %v1843_v2  ;;  %1375 = vmatprep.subr.mxu1 %v1843_v2 }
  0x6a   : > { %1341 = vmatpush3.msra.mxu0 %v423_v28  ;;  %1376 = vmatpush3.msra.mxu1 %v400_v29  ;;  %v773_v28 = vld [vmem:[#allocation5 + $0x8] sm:$0xff]  ;;  %v772_v29 = vld [vmem:[#allocation5] sm:$0xff] }
  0x6b   : > { %1342 = vmatprep.subr.mxu0 %v1843_v2  ;;  %1377 = vmatprep.subr.mxu1 %v1843_v2 }
  0x6c   : > { %1343 = vmatpush3.msra.mxu0 %v422_v30  ;;  %1378 = vmatpush3.msra.mxu1 %v399_v31  ;;  %v881_v30 = vld [vmem:[#allocation7 + $0x78] sm:$0xff]  ;;  %v880_v31 = vld [vmem:[#allocation7 + $0x70] sm:$0xff] }
  0x6d   : > { %1344 = vmatprep.subr.mxu0 %v1843_v2  ;;  %1379 = vmatprep.subr.mxu1 %v1843_v2 }
  0x6e   : > { %1345 = vmatpush3.msra.mxu0 %v421_v32  ;;  %1380 = vmatpush3.msra.mxu1 %v398_v33  ;;  %v879_v32 = vld [vmem:[#allocation7 + $0x68] sm:$0xff]  ;;  %v878_v33 = vld [vmem:[#allocation7 + $0x60] sm:$0xff] }
  0x6f   : > { %1346 = vmatprep.subr.mxu0 %v1843_v2  ;;  %1381 = vmatprep.subr.mxu1 %v1843_v2 }
  0x70   : > { %1347 = vmatpush3.msra.mxu0 %v420_v34  ;;  %1382 = vmatpush3.msra.mxu1 %v397_v35  ;;  %v877_v34 = vld [vmem:[#allocation7 + $0x58] sm:$0xff]  ;;  %v876_v35 = vld [vmem:[#allocation7 + $0x50] sm:$0xff] }
  0x71   : > { %1348 = vmatprep.subr.mxu0 %v1843_v2  ;;  %1383 = vmatprep.subr.mxu1 %v1843_v2 }
  0x72   : > { %1349 = vmatpush3.msra.mxu0 %v419_v36  ;;  %1384 = vmatpush3.msra.mxu1 %v396_v37  ;;  %v875_v36 = vld [vmem:[#allocation7 + $0x48] sm:$0xff]  ;;  %v874_v37 = vld [vmem:[#allocation7 + $0x40] sm:$0xff] }
  0x73   : > { %1388 = vmatprep.subr.mxu0 %v1843_v2  ;;  %1423 = vmatprep.subr.mxu1 %v1843_v2 }
  0x74   : > { %1656 = vset.pattern.permute.xlu0 %v1846_v9  ;;  %v582_v9 = vld [vmem:[#allocation2 + $0x100] sm:$0xff] }
  0xcf   : > { %v414_v40 = vpop.permute.xlu0 %413  ;;  %v577_v6 = vpop.permute.xlu1 %576 }
  0xd0   : > { %vm415_vm1 = vcmp.eq.s32.totalorder %v2065_v39, %v414_v40  ;;  %vm578_vm3 = vcmp.eq.s32.totalorder %v2065_v39, %v577_v6  ;;  %v871_v40 = vld [vmem:[#allocation7 + $0x28] sm:$0xff]  ;;  %v967_v6 = vld [vmem:[#allocation8 + $0x30] sm:$0xff] }
  0xd1   : > { %1351 = vmatmul.mubr.msk.f32.vlgmr.msra.gmra.mxu0 %vm415_vm1, %v1847_v42 }
  0xd2   : > { %1389 = vmatpush3.msra.mxu0 %v597_v41  ;;  %1420 = vmatprep.mubr.msk.f32.mxu0 %vm1844_vm0, %v1843_v2  ;;  %v870_v41 = vld [vmem:[#allocation7 + $0x20] sm:$0xff] }
  0xd3   : > { %1390 = vmatprep.subr.mxu0 %v1843_v2 }
  0xd4   : > { %1391 = vmatpush3.msra.mxu0 %v596_v43  ;;  %v392_v45 = vpop.permute.xlu0 %391  ;;  %v671_v12 = vpop.permute.xlu1 %670 }
  0xd5   : > { %1392 = vmatprep.subr.mxu0 %v1843_v2  ;;  %vm393_vm2 = vcmp.eq.s32.totalorder %v2065_v39, %v392_v45  ;;  %vm672_vm4 = vcmp.eq.s32.totalorder %v2065_v39, %v671_v12  ;;  %v872_v39 = vld [vmem:[#allocation7 + $0x30] sm:$0xff] }
  0xd6   : > { %1393 = vmatpush3.msra.mxu0 %v595_v44  ;;  %1386 = vmatmul.mubr.msk.f32.vlgmr.msra.gmra.mxu1 %vm393_vm2, %v1847_v42 }
  0xd7   : > { %1394 = vmatprep.subr.mxu0 %v1843_v2  ;;  %1424 = vmatpush3.msra.mxu1 %v691_v46 }
  0xd8   : > { %1395 = vmatpush3.msra.mxu0 %v594_v47  ;;  %1425 = vmatprep.subr.mxu1 %v1843_v2 }
  0xd9   : > { %1396 = vmatprep.subr.mxu0 %v1843_v2  ;;  %1426 = vmatpush3.msra.mxu1 %v690_v48 }
  0xda   : > { %1397 = vmatpush3.msra.mxu0 %v593_v49  ;;  %1427 = vmatprep.subr.mxu1 %v1843_v2 }
  0xdb   : > { %1398 = vmatprep.subr.mxu0 %v1843_v2  ;;  %1428 = vmatpush3.msra.mxu1 %v689_v50 }
  0xdc   : > { %1399 = vmatpush3.msra.mxu0 %v592_v51  ;;  %1429 = vmatprep.subr.mxu1 %v1843_v2 }
  0xdd   : > { %1400 = vmatprep.subr.mxu0 %v1843_v2  ;;  %1430 = vmatpush3.msra.mxu1 %v688_v52  ;;  %v1191_v52 = vld [vmem:[%s2224_s2] ss:$0 sm:$0xff] }
  0xde   : > { %1401 = vmatpush3.msra.mxu0 %v591_v53  ;;  %1431 = vmatprep.subr.mxu1 %v1843_v2 }
  0xdf   : > { %1402 = vmatprep.subr.mxu0 %v1843_v2  ;;  %1432 = vmatpush3.msra.mxu1 %v687_v54 }
  0xe0   : > { %1403 = vmatpush3.msra.mxu0 %v590_v55  ;;  %1433 = vmatprep.subr.mxu1 %v1843_v2 }
  0xe1   : > { %1404 = vmatprep.subr.mxu0 %v1843_v2  ;;  %1434 = vmatpush3.msra.mxu1 %v686_v56 }
  0xe2   : > { %1405 = vmatpush3.msra.mxu0 %v589_v57  ;;  %1435 = vmatprep.subr.mxu1 %v1843_v2  ;;  %v868_v57 = vld [vmem:[#allocation7 + $0x10] sm:$0xff] }
  0xe3   : > { %1406 = vmatprep.subr.mxu0 %v1843_v2  ;;  %1436 = vmatpush3.msra.mxu1 %v685_v58  ;;  %v867_v58 = vld [vmem:[#allocation7 + $0x8] sm:$0xff] }
  0xe4   : > { %1407 = vmatpush3.msra.mxu0 %v588_v59  ;;  %1437 = vmatprep.subr.mxu1 %v1843_v2  ;;  %v866_v59 = vld [vmem:[#allocation7] sm:$0xff] }
  0xe5   : > { %1408 = vmatprep.subr.mxu0 %v1843_v2  ;;  %1438 = vmatpush3.msra.mxu1 %v684_v60  ;;  %v976_v60 = vld [vmem:[#allocation8 + $0x78] sm:$0xff] }
  0xe6   : > { %1409 = vmatpush3.msra.mxu0 %v587_v61  ;;  %1439 = vmatprep.subr.mxu1 %v1843_v2  ;;  %v975_v61 = vld [vmem:[#allocation8 + $0x70] sm:$0xff] }
  0xe7   : > { %1410 = vmatprep.subr.mxu0 %v1843_v2  ;;  %1440 = vmatpush3.msra.mxu1 %v683_v62  ;;  %v974_v62 = vld [vmem:[#allocation8 + $0x68] sm:$0xff] }
  0xe8   : > { %1411 = vmatpush3.msra.mxu0 %v586_v63  ;;  %1441 = vmatprep.subr.mxu1 %v1843_v2  ;;  %v973_v63 = vld [vmem:[#allocation8 + $0x60] sm:$0xff] }
  0xe9   : > { %1412 = vmatprep.subr.mxu0 %v1843_v2  ;;  %1442 = vmatpush3.msra.mxu1 %v682_v0  ;;  %v972_v0 = vld [vmem:[#allocation8 + $0x58] sm:$0xff] }
  0xea   : > { %1413 = vmatpush3.msra.mxu0 %v585_v1  ;;  %1443 = vmatprep.subr.mxu1 %v1843_v2  ;;  %v971_v1 = vld [vmem:[#allocation8 + $0x50] sm:$0xff] }
  0xeb   : > { %1414 = vmatprep.subr.mxu0 %v1843_v2  ;;  %1444 = vmatpush3.msra.mxu1 %v681_v3  ;;  %v970_v3 = vld [vmem:[#allocation8 + $0x48] sm:$0xff] }
  0xec   : > { %1415 = vmatpush3.msra.mxu0 %v584_v4  ;;  %1445 = vmatprep.subr.mxu1 %v1843_v2  ;;  %v969_v4 = vld [vmem:[#allocation8 + $0x40] sm:$0xff] }
  0xed   : > { %1416 = vmatprep.subr.mxu0 %v1843_v2  ;;  %1446 = vmatpush3.msra.mxu1 %v680_v5  ;;  %v968_v5 = vld [vmem:[#allocation8 + $0x38] sm:$0xff] }
  0xee   : > { %1417 = vmatpush3.msra.mxu0 %v583_v7  ;;  %1447 = vmatprep.subr.mxu1 %v1843_v2  ;;  %v966_v7 = vld [vmem:[#allocation8 + $0x28] sm:$0xff] }
  0xef   : > { %1418 = vmatprep.subr.mxu0 %v1843_v2  ;;  %1448 = vmatpush3.msra.mxu1 %v679_v8  ;;  %v965_v8 = vld [vmem:[#allocation8 + $0x20] sm:$0xff] }
  0xf0   : > { %1419 = vmatpush3.msra.mxu0 %v582_v9  ;;  %1449 = vmatprep.subr.mxu1 %v1843_v2  ;;  %v1192_v9 = vld [vmem:[%s2226_s4] ss:$0 sm:$0xff] }
  0xf1   : > { %1421 = vmatmul.mubr.msk.f32.vlgmr.msra.gmra.mxu0 %vm578_vm3, %v1847_v42  ;;  %1450 = vmatpush3.msra.mxu1 %v678_v10 }
  0xf2   : > { %1451 = vmatprep.subr.mxu1 %v1843_v2  ;;  %1455 = vmatprep.mubr.msk.f32.mxu1 %vm1844_vm0, %v1843_v2 }
  0xf3   : > { %1452 = vmatpush3.msra.mxu1 %v677_v11  ;;  %1458 = vmatprep.subr.mxu0 %v1843_v2 }
  0xf4   : > { %1453 = vmatprep.subr.mxu1 %v1843_v2  ;;  %1490 = vmatprep.mubr.msk.f32.mxu0 %vm1844_vm0, %v1843_v2 }
  0xf5   : > { %1454 = vmatpush3.msra.mxu1 %v676_v13  ;;  %1459 = vmatpush3.msra.mxu0 %v787_v14  ;;  %v964_v14 = vld [vmem:[#allocation8 + $0x18] sm:$0xff] }
  0xf6   : > { %1456 = vmatmul.mubr.msk.f32.vlgmr.msra.gmra.mxu1 %vm672_vm4, %v1847_v42  ;;  %1493 = vmatprep.subr.mxu1 %v1843_v2  ;;  %v869_v42 = vld [vmem:[#allocation7 + $0x18] sm:$0xff] }
  0xf7   : > { %1525 = vmatprep.mubr.msk.f32.mxu1 %vm1844_vm0, %v1843_v2  ;;  %1460 = vmatprep.subr.mxu0 %v1843_v2 }
  0xf8   : > { %1461 = vmatpush3.msra.mxu0 %v786_v15  ;;  %1494 = vmatpush3.msra.mxu1 %v881_v30  ;;  %v963_v15 = vld [vmem:[#allocation8 + $0x10] sm:$0xff] }
  0xf9   : > { %1462 = vmatprep.subr.mxu0 %v1843_v2  ;;  %1495 = vmatprep.subr.mxu1 %v1843_v2 }
  0xfa   : > { %1463 = vmatpush3.msra.mxu0 %v785_v16  ;;  %1496 = vmatpush3.msra.mxu1 %v880_v31  ;;  %v962_v16 = vld [vmem:[#allocation8 + $0x8] sm:$0xff] }
  0xfb   : > { %1464 = vmatprep.subr.mxu0 %v1843_v2  ;;  %1497 = vmatprep.subr.mxu1 %v1843_v2 }
  0xfc   : > { %1465 = vmatpush3.msra.mxu0 %v784_v17  ;;  %1498 = vmatpush3.msra.mxu1 %v879_v32  ;;  %v961_v17 = vld [vmem:[#allocation8] sm:$0xff] }
  0xfd   : > { %1466 = vmatprep.subr.mxu0 %v1843_v2  ;;  %1499 = vmatprep.subr.mxu1 %v1843_v2 }
  0xfe   : > { %1467 = vmatpush3.msra.mxu0 %v783_v18  ;;  %1500 = vmatpush3.msra.mxu1 %v878_v33  ;;  %v1193_v18 = vld [vmem:[%s2228_s6] ss:$0 sm:$0xff] }
  0xff   : > { %1468 = vmatprep.subr.mxu0 %v1843_v2  ;;  %1501 = vmatprep.subr.mxu1 %v1843_v2 }
 0x100   : > { %1469 = vmatpush3.msra.mxu0 %v782_v19  ;;  %1502 = vmatpush3.msra.mxu1 %v877_v34 }
 0x101   : > { %1470 = vmatprep.subr.mxu0 %v1843_v2  ;;  %1503 = vmatprep.subr.mxu1 %v1843_v2 }
 0x102   : > { %1471 = vmatpush3.msra.mxu0 %v781_v20  ;;  %1504 = vmatpush3.msra.mxu1 %v876_v35 }
 0x103   : > { %1472 = vmatprep.subr.mxu0 %v1843_v2  ;;  %1505 = vmatprep.subr.mxu1 %v1843_v2 }
 0x104   : > { %1473 = vmatpush3.msra.mxu0 %v780_v21  ;;  %1506 = vmatpush3.msra.mxu1 %v875_v36 }
 0x105   : > { %1474 = vmatprep.subr.mxu0 %v1843_v2  ;;  %1507 = vmatprep.subr.mxu1 %v1843_v2 }
 0x106   : > { %1475 = vmatpush3.msra.mxu0 %v779_v22  ;;  %1508 = vmatpush3.msra.mxu1 %v874_v37 }
 0x107   : > { %1476 = vmatprep.subr.mxu0 %v1843_v2  ;;  %1509 = vmatprep.subr.mxu1 %v1843_v2 }
 0x108   : > { %1477 = vmatpush3.msra.mxu0 %v778_v23  ;;  %1510 = vmatpush3.msra.mxu1 %v873_v38 }
 0x109   : > { %1478 = vmatprep.subr.mxu0 %v1843_v2  ;;  %1511 = vmatprep.subr.mxu1 %v1843_v2 }
 0x10a   : > { %1479 = vmatpush3.msra.mxu0 %v777_v24  ;;  %1512 = vmatpush3.msra.mxu1 %v872_v39 }
 0x10b   : > { %1480 = vmatprep.subr.mxu0 %v1843_v2  ;;  %1513 = vmatprep.subr.mxu1 %v1843_v2 }
 0x10c   : > { %1481 = vmatpush3.msra.mxu0 %v776_v25  ;;  %1514 = vmatpush3.msra.mxu1 %v871_v40 }
 0x10d   : > { %1482 = vmatprep.subr.mxu0 %v1843_v2  ;;  %1515 = vmatprep.subr.mxu1 %v1843_v2 }
 0x10e   : > { %1483 = vmatpush3.msra.mxu0 %v775_v26  ;;  %1516 = vmatpush3.msra.mxu1 %v870_v41 }
 0x10f   : > { %1484 = vmatprep.subr.mxu0 %v1843_v2  ;;  %1517 = vmatprep.subr.mxu1 %v1843_v2 }
 0x110   : > { %1485 = vmatpush3.msra.mxu0 %v774_v27  ;;  %1518 = vmatpush3.msra.mxu1 %v869_v42 }
 0x111   : > { %1486 = vmatprep.subr.mxu0 %v1843_v2  ;;  %1519 = vmatprep.subr.mxu1 %v1843_v2 }
 0x112   : > { %1487 = vmatpush3.msra.mxu0 %v773_v28  ;;  %1520 = vmatpush3.msra.mxu1 %v868_v57 }
 0x113   : > { %1488 = vmatprep.subr.mxu0 %v1843_v2  ;;  %1521 = vmatprep.subr.mxu1 %v1843_v2 }
 0x114   : > { %1489 = vmatpush3.msra.mxu0 %v772_v29  ;;  %1522 = vmatpush3.msra.mxu1 %v867_v58 }
 0x115   : > { %1528 = vmatprep.subr.mxu0 %v1843_v2  ;;  %1523 = vmatprep.subr.mxu1 %v1843_v2 }
 0x116   : > { %1524 = vmatpush3.msra.mxu1 %v866_v59 }
 0x191   : > { %v501_v43 = vpop.f32.mrf.mxu0 }
 0x193   : > { %v1352_v44 = vpop.f32.mrf.mxu0 }
 0x196   : > { %v571_v45 = vpop.f32.mrf.mxu1 }
 0x197   : > { %v572_v48 = vadd.f32 %v571_v45, %v501_v43 }
 0x198   : > { %v1387_v46 = vpop.f32.mrf.mxu1 }
 0x1b1   : > { %v664_v47 = vpop.f32.mrf.mxu0 }
 0x1b2   : > { %v668_v50 = vadd.f32 %v664_v47, %v572_v48 }
 0x1b3   : > { %v1422_v49 = vpop.f32.mrf.mxu0 }
 0x1b6   : > { %v758_v51 = vpop.f32.mrf.mxu1 }
 0x1b7   : > { %v762_v53 = vadd.f32 %v758_v51, %v668_v50 }
 0x1b8   : > { %v1457_v54 = vpop.f32.mrf.mxu1 }
 0x1b9   : > { %v2147_v55 = vadd.f32 %v1191_v52, %v762_v53 }
 0x1bb   : > { %v771_v56 = vmax.f32 %v2147_v55, 0.0 }
 0x1bd   : > { %1491 = vmatmul.mubr.f32.vlgmr.msra.gmra.mxu0 %v771_v56 }
 0x1be   : > { %1560 = vmatprep.mubr.msk.f32.mxu0 %vm1844_vm0, %v1843_v2  ;;  %1529 = vmatpush3.msra.mxu0 %v976_v60 }
 0x1bf   : > { %1530 = vmatprep.subr.mxu0 %v1843_v2 }
 0x1c0   : > { %1531 = vmatpush3.msra.mxu0 %v975_v61 }
 0x1c1   : > { %1532 = vmatprep.subr.mxu0 %v1843_v2 }
 0x1c2   : > { %1533 = vmatpush3.msra.mxu0 %v974_v62 }
 0x1c3   : > { %1534 = vmatprep.subr.mxu0 %v1843_v2 }
 0x1c4   : > { %1535 = vmatpush3.msra.mxu0 %v973_v63 }
 0x1c5   : > { %1536 = vmatprep.subr.mxu0 %v1843_v2 }
 0x1c6   : > { %1537 = vmatpush3.msra.mxu0 %v972_v0 }
 0x1c7   : > { %1538 = vmatprep.subr.mxu0 %v1843_v2 }
 0x1c8   : > { %1539 = vmatpush3.msra.mxu0 %v971_v1 }
 0x1c9   : > { %1540 = vmatprep.subr.mxu0 %v1843_v2 }
 0x1ca   : > { %1541 = vmatpush3.msra.mxu0 %v970_v3 }
 0x1cb   : > { %1542 = vmatprep.subr.mxu0 %v1843_v2 }
 0x1cc   : > { %1543 = vmatpush3.msra.mxu0 %v969_v4 }
 0x1cd   : > { %1544 = vmatprep.subr.mxu0 %v1843_v2 }
 0x1ce   : > { %1545 = vmatpush3.msra.mxu0 %v968_v5 }
 0x1cf   : > { %1546 = vmatprep.subr.mxu0 %v1843_v2 }
 0x1d0   : > { %1547 = vmatpush3.msra.mxu0 %v967_v6 }
 0x1d1   : > { %1548 = vmatprep.subr.mxu0 %v1843_v2 }
 0x1d2   : > { %1549 = vmatpush3.msra.mxu0 %v966_v7 }
 0x1d3   : > { %1550 = vmatprep.subr.mxu0 %v1843_v2 }
 0x1d4   : > { %1551 = vmatpush3.msra.mxu0 %v965_v8 }
 0x1d5   : > { %1552 = vmatprep.subr.mxu0 %v1843_v2 }
 0x1d6   : > { %1553 = vmatpush3.msra.mxu0 %v964_v14 }
 0x1d7   : > { %1554 = vmatprep.subr.mxu0 %v1843_v2 }
 0x1d8   : > { %1555 = vmatpush3.msra.mxu0 %v963_v15 }
 0x1d9   : > { %1556 = vmatprep.subr.mxu0 %v1843_v2 }
 0x1da   : > { %1557 = vmatpush3.msra.mxu0 %v962_v16 }
 0x1db   : > { %1558 = vmatprep.subr.mxu0 %v1843_v2  ;;  %v1194_v2 = vld [vmem:[%s2230_s8] ss:$0 sm:$0xff] }
 0x1dc   : > { %1559 = vmatpush3.msra.mxu0 %v961_v17 }
 0x27d   : > { %v861_v10 = vpop.f32.mrf.mxu0 }
 0x27e   : > { %v862_v11 = vadd.f32 %v1192_v9, %v861_v10 }
 0x27f   : > { %v1492_v12 = vpop.f32.mrf.mxu0 }
 0x280   : > { %v865_v13 = vmax.f32 %v862_v11, 0.0 }
 0x282   : > { %1526 = vmatmul.mubr.f32.vlgmr.msra.gmra.mxu1 %v865_v13 }
 0x342   : > { %v955_v19 = vpop.f32.mrf.mxu1 }
 0x343   : > { %v956_v20 = vadd.f32 %v1193_v18, %v955_v19 }
 0x344   : > { %v1527_v21 = vpop.f32.mrf.mxu1 }
 0x345   : > { %v959_v22 = vadd.f32 %v956_v20, %v771_v56 }
 0x347   : > { %v960_v23 = vmax.f32 %v959_v22, 0.0 }
 0x349   : > { %1561 = vmatmul.mubr.f32.vlgmr.msra.gmra.mxu0 %v960_v23 }
 0x409   : > { %v1050_v24 = vpop.f32.mrf.mxu0 }
 0x40a   : > { %v1051_v25 = vadd.f32 %v1194_v2, %v1050_v24 }
 0x40b   : > { %v1562_v26 = vpop.f32.mrf.mxu0 }
 0x40c   : > { %1054 = vst [vmem:[%s382_s23] sm:$0xff] %v1051_v25 }
 0x40d   : > { %1774 = shalt.err (!%p1771_p11)
}
 0x40e   : > { %s1775_s14 = scalar_lea.hbm %s2187_s25, 128  ;;  %s1779_s23 = scalar_lea.hbm %s2231_s9, 256 }
 0x40f   : > { %p1776_p0 = scmp.ne.s32.totalorder %s2187_s25, %s1775_s14  ;;  %p1780_p3 = scmp.lt.s32.totalorder %s2187_s25, %s2231_s9 }
 0x410   : > { %p1781_p10 = scmp.lt.s32.totalorder %s1779_s23, %s1775_s14 }
 0x411   : > { %p1777_p2 = pnand %p1776_p0, %p1937_p5 }
 0x412   : > { %p1782_p9 = por %p1781_p10, %p1780_p3 }
 0x413   : > { %p1778_p1 = pneg %p1777_p2 }
 0x415   : > { %p1783_p12 = pnand %p1782_p9, %p1778_p1 }
 0x417   : > { %1786 = shalt.err (!%p1783_p12)
}
 0x418   : > { %1579 = dma.vmem_to_hbm [thread:$0]  (%p1937_p5), %s1070_s17, 128, %s2187_s25, %s1056_s27  }
 0x419 PF: > { %p1606_p13 = scmp.ge.s32.totalorder %s1833_s12, 2  ;;  %s1081_s28 = sand.u32 1, %s1821_s30  }
 0x41a   : > { %s1082_s24 = scalar_lea.sflag [#allocation4], %s1081_s28 }
 0x41b   : > { %p1595_p4 = pnand %p1606_p13, %p1941_p6 }
 0x41d   : > { %p1596_p7 = pneg %p1595_p4 }
 0x41f   : > { %1816 = dma.done.wait (%p1596_p7), %s1082_s24, 128  }
 0x420   : > { %1818 = vsyncadd (%p1596_p7), %s1082_s24, 4294967168  ;;  %p22_p8 = scmp.ge.s32.totalorder %s1924_s15, 4   ;;  %s2236_s30 = smov %s1825_s10 }
 0x421   : > { %s2237_s10 = smov %s1829_s11  ;;  %s2238_s11 = smov %s1935_s18 }
 0x422   : > { %s2239_s12 = smov %s1924_s15  ;;  %24 = sbr.rel (!%p22_p8) target bundleno = 6 (0x6), region = 111 }
 0x427   :  { %1087 = vsyncpa [#allocation3], 1 }
 0x428   :  { %1089 = vsyncpa [#allocation3 + $0x1], 1 }
 0x429   :  { %1090 = vsyncpa [#allocation6], 1 }
 0x42a   :  { %1091 = vsyncpa [#allocation9], 1 }
 0x42b   :  { %1092 = vsyncpa [#allocation4], 1 }
 0x42c   :  { %1094 = vsyncpa [#allocation4 + $0x1], 1 }

</bundles_post_ra>
